<compile_context>
chip_gen: v5e
topology: v5e:2x2
jax: 0.10.0
libtpu: 0.0.40
codegen_flags: <defaults>
</compile_context>

<pallas_src>
import jax
import jax.numpy as jnp
from jax import lax
from jax.experimental import pallas as pl
from jax.experimental.pallas import tpu as pltpu


def _round_up(x, m):
    return ((x + m - 1) // m) * m


def _conv1d_kernel(xc_ref, xn_ref, w_ref, b_ref, o_ref):
    # xc_ref / xn_ref: (1, C, TL)  current / next length tile of the input
    # w_ref:           (F, K*C)    tap weights folded into the contraction dim
    # b_ref:           (F, 1)      bias (f32)
    # o_ref:           (1, F, TL)  output tile (NCW, lane-dense)
    C = xc_ref.shape[1]
    TL = o_ref.shape[2]
    K = w_ref.shape[1] // C

    # Current tile + halo from the next tile; length stays on the lane axis.
    full = jnp.concatenate([xc_ref[0], xn_ref[0]], axis=-1)            # (C, 2*TL)

    # im2col: rhs[k*C + c, l] = x[c, l + k]  -> one matmul for all K taps.
    taps = [full[:, k:k + TL] for k in range(K)]
    rhs = taps[0] if K == 1 else jnp.concatenate(taps, axis=0)         # (K*C, TL)

    acc = jnp.dot(w_ref[...], rhs, preferred_element_type=jnp.float32)  # (F, TL)
    acc = acc + b_ref[...]                                             # bias once
    o_ref[0] = acc.astype(o_ref.dtype)


def conv_block_pallas(input_ids, weight, bias, *, tile_l=512, compute_dtype=None):
    """Implied ConvBlock compute: valid Conv1d(n_filters, kernel_size) + bias.

    input_ids: (B, C_in, L)  (PyTorch NCW)
    weight:    (F, C_in, K)  (PyTorch Conv1d weight layout)
    bias:      (F,)
    returns:   (B, F, L - K + 1)  (NCW)

    compute_dtype: optional MXU operand dtype (e.g. jnp.bfloat16 on v6e/v7x);
    accumulation is always f32.
    """
    B, C, L = input_ids.shape
    F, C_w, K = weight.shape
    if C_w != C:
        raise ValueError("in_channels mismatch between input and weight")
    if K > L:
        raise ValueError("kernel_size must be <= input length for a VALID conv")
    L_out = L - K + 1

    # Length tile: lane-dense (multiple of 128), capped by tile_l, and >= K-1
    # so a single next-tile halo always suffices.
    TL = min(max(tile_l, 128), _round_up(L_out, 128))
    TL = _round_up(max(TL, K - 1), 128)
    J = pl.cdiv(L_out, TL)       # number of length tiles
    L_pad = (J + 1) * TL         # extra zero tile so the last step's "next"
                                 # (halo) block is in-bounds and reads zeros

    cdt = jnp.dtype(compute_dtype) if compute_dtype is not None else input_ids.dtype
    out_dtype = input_ids.dtype

    # Cheap layout plumbing (plain JAX): zero-pad length; fold weight (F,C,K)
    # into (F, K*C) with row order k*C + c to match the in-kernel im2col.
    x_pad = jnp.pad(input_ids, ((0, 0), (0, 0), (0, L_pad - L))).astype(cdt)
    w2 = jnp.transpose(weight, (0, 2, 1)).reshape(F, K * C).astype(cdt)
    b2 = bias.reshape(F, 1).astype(jnp.float32)

    # VMEM budget: double-buffered per-step tiles + resident weights/bias +
    # in-kernel temporaries (halo concat, im2col, f32 accumulator).
    bpe_in = jnp.dtype(cdt).itemsize
    bpe_out = jnp.dtype(out_dtype).itemsize
    tile_bytes = 2 * (2 * C * TL * bpe_in) + 2 * (F * TL * bpe_out)
    scratch_bytes = (2 * TL * C + K * C * TL) * bpe_in + F * TL * 4
    const_bytes = (F * K * C) * bpe_in + F * 4
    vmem_limit = int(min(max(2 * (tile_bytes + scratch_bytes + const_bytes),
                             32 * 1024 * 1024),
                         48 * 1024 * 1024))  # <= ~48 MiB keeps v7x (64 MiB) happy

    cost = pl.CostEstimate(
        flops=2 * B * L_out * K * C * F,
        transcendentals=0,
        bytes_accessed=(B * C * L * bpe_in + (F * C * K + F) * 4
                        + B * F * L_out * bpe_out),
    )

    out_pad = pl.pallas_call(
        _conv1d_kernel,
        out_shape=jax.ShapeDtypeStruct((B, F, J * TL), out_dtype),
        grid=(B, J),
        in_specs=[
            pl.BlockSpec((1, C, TL), lambda b, j: (b, 0, j)),      # current tile
            pl.BlockSpec((1, C, TL), lambda b, j: (b, 0, j + 1)),  # next tile (halo)
            pl.BlockSpec((F, K * C), lambda b, j: (0, 0)),         # weights (resident)
            pl.BlockSpec((F, 1), lambda b, j: (0, 0)),             # bias (resident)
        ],
        out_specs=pl.BlockSpec((1, F, TL), lambda b, j: (b, 0, j)),
        compiler_params=pltpu.CompilerParams(
            dimension_semantics=("parallel", "parallel"),
            vmem_limit_bytes=vmem_limit,
        ),
        cost_estimate=cost,
    )(x_pad, x_pad, w2, b2)

    # Drop the lane padding; output is already NCW.
    return out_pad[:, :, :L_out]


class ConvBlock:
    """Faithful port of the reference module (forward is a stub)."""

    def __init__(self, n_filters, kernel_size):
        self.n_filters = n_filters
        self.kernel_size = kernel_size

    def forward(self, input_ids):
        # TODO(synk): the reference PyTorch forward() returns None (no layers
        # are defined); the implied conv hot path is conv_block_pallas() above.
        return None


if __name__ == "__main__":
    key = jax.random.PRNGKey(0)
    kx, kw, kb = jax.random.split(key, 3)

    B, C_in, L = 2, 4, 16
    n_filters, kernel_size = 8, 3

    x = jax.random.normal(kx, (B, C_in, L), dtype=jnp.float32)
    w = jax.random.normal(kw, (n_filters, C_in, kernel_size), dtype=jnp.float32) * 0.1
    b = jax.random.normal(kb, (n_filters,), dtype=jnp.float32) * 0.1

    # Faithful forward semantics (stub).
    block = ConvBlock(n_filters, kernel_size)
    assert block.forward(x) is None

    # Run the implied-conv Pallas kernel.
    out = conv_block_pallas(x, w, b)
    out = jax.block_until_ready(out)

    # Sanity check against a pure-JAX conv reference.
    ref = lax.conv_general_dilated(
        x, w, window_strides=(1,), padding="VALID",
        dimension_numbers=("NCH", "OIH", "NCH"),
    ) + b.reshape(1, n_filters, 1)
    assert out.shape == (B, n_filters, L - kernel_size + 1)
    assert jnp.allclose(out, ref, atol=1e-4, rtol=1e-4)

    print("KERNEL_OK")
</pallas_src>

<mosaic_0001>
module attributes {stable_mosaic.version = 11 : i64} {
  func.func @_conv1d_kernel(%arg0: i32, %arg1: i32, %arg2: memref<1x4x128xf32, #tpu.memory_space<vmem>>, %arg3: memref<1x4x128xf32, #tpu.memory_space<vmem>>, %arg4: memref<8x12xf32, #tpu.memory_space<vmem>>, %arg5: memref<8x1xf32, #tpu.memory_space<vmem>>, %arg6: memref<1x8x128xf32, #tpu.memory_space<vmem>>) attributes {dimension_semantics = [#tpu.dimension_semantics<parallel>, #tpu.dimension_semantics<parallel>], iteration_bounds = array<i64: 2, 1>, scalar_prefetch = 0 : i64, scratch_operands = 0 : i64, tpu.core_type = #tpu.core_type<tc>, window_params = [{transform_indices = @transform_0, window_bounds = array<i64: 1, 4, 128>}, {transform_indices = @transform_1, window_bounds = array<i64: 1, 4, 128>}, {pipeline_mode = #tpu.pipeline_mode<synchronous>, transform_indices = @transform_2, window_bounds = array<i64: 8, 12>}, {pipeline_mode = #tpu.pipeline_mode<synchronous>, transform_indices = @transform_3, window_bounds = array<i64: 8, 1>}, {transform_indices = @transform_4, window_bounds = array<i64: 1, 8, 128>}]} {
    %c0 = arith.constant 0 : index
    %c0_0 = arith.constant 0 : index
    %c0_1 = arith.constant 0 : index
    %0 = vector.load %arg2[%c0, %c0_0, %c0_1] : memref<1x4x128xf32, #tpu.memory_space<vmem>>, vector<1x4x128xf32>
    %1 = vector.shape_cast %0 : vector<1x4x128xf32> to vector<4x128xf32>
    %c0_2 = arith.constant 0 : index
    %c0_3 = arith.constant 0 : index
    %c0_4 = arith.constant 0 : index
    %2 = vector.load %arg3[%c0_2, %c0_3, %c0_4] : memref<1x4x128xf32, #tpu.memory_space<vmem>>, vector<1x4x128xf32>
    %3 = vector.shape_cast %2 : vector<1x4x128xf32> to vector<4x128xf32>
    %4 = tpu.concatenate %1, %3 in 1 : vector<4x128xf32>, vector<4x128xf32> -> vector<4x256xf32>
    %5 = vector.extract_strided_slice %4 {offsets = [0, 0], sizes = [4, 128], strides = [1, 1]} : vector<4x256xf32> to vector<4x128xf32>
    %6 = vector.extract_strided_slice %4 {offsets = [0, 1], sizes = [4, 128], strides = [1, 1]} : vector<4x256xf32> to vector<4x128xf32>
    %7 = vector.extract_strided_slice %4 {offsets = [0, 2], sizes = [4, 128], strides = [1, 1]} : vector<4x256xf32> to vector<4x128xf32>
    %8 = tpu.concatenate %5, %6, %7 in 0 : vector<4x128xf32>, vector<4x128xf32>, vector<4x128xf32> -> vector<12x128xf32>
    %c0_5 = arith.constant 0 : index
    %c0_6 = arith.constant 0 : index
    %9 = vector.load %arg4[%c0_5, %c0_6] : memref<8x12xf32, #tpu.memory_space<vmem>>, vector<8x12xf32>
    %cst = arith.constant dense<0.000000e+00> : vector<8x128xf32>
    %10 = tpu.matmul %9, %8, %cst {dimension_numbers = #tpu.dot_dimension_numbers<[1], [0], [0], [1], [0, 0, 1, 1], [], []>} : vector<8x12xf32>, vector<12x128xf32>, vector<8x128xf32> -> vector<8x128xf32>
    %c0_7 = arith.constant 0 : index
    %c0_8 = arith.constant 0 : index
    %11 = vector.load %arg5[%c0_7, %c0_8] : memref<8x1xf32, #tpu.memory_space<vmem>>, vector<8x1xf32>
    %12 = vector.broadcast %11 : vector<8x1xf32> to vector<8x128xf32>
    %13 = arith.addf %10, %12 : vector<8x128xf32>
    %c0_9 = arith.constant 0 : index
    %c0_10 = arith.constant 0 : index
    %c0_11 = arith.constant 0 : index
    %14 = vector.load %arg6[%c0_9, %c0_10, %c0_11] : memref<1x8x128xf32, #tpu.memory_space<vmem>>, vector<1x8x128xf32>
    %15 = vector.shape_cast %14 : vector<1x8x128xf32> to vector<8x128xf32>
    %16 = vector.shape_cast %13 : vector<8x128xf32> to vector<1x8x128xf32>
    tpu.vector_store %arg6[%c0_9, %c0_10, %c0_11], %16 {strides = array<i32>} : memref<1x8x128xf32, #tpu.memory_space<vmem>>, vector<1x8x128xf32>,
    return
  }
  func.func @transform_0(%arg0: i32, %arg1: i32) -> (i32, i32, i32) {
    %c0_i32 = arith.constant 0 : i32
    %c0_i32_0 = arith.constant 0 : i32
    return %arg0, %c0_i32, %arg1 : i32, i32, i32
  }
  func.func @transform_1(%arg0: i32, %arg1: i32) -> (i32, i32, i32) {
    %c1_i32 = arith.constant 1 : i32
    %0 = arith.addi %arg1, %c1_i32 : i32
    %c0_i32 = arith.constant 0 : i32
    %c0_i32_0 = arith.constant 0 : i32
    return %arg0, %c0_i32, %0 : i32, i32, i32
  }
  func.func @transform_2(%arg0: i32, %arg1: i32) -> (i32, i32) {
    %c0_i32 = arith.constant 0 : i32
    %c0_i32_0 = arith.constant 0 : i32
    %c0_i32_1 = arith.constant 0 : i32
    return %c0_i32, %c0_i32_0 : i32, i32
  }
  func.func @transform_3(%arg0: i32, %arg1: i32) -> (i32, i32) {
    %c0_i32 = arith.constant 0 : i32
    %c0_i32_0 = arith.constant 0 : i32
    %c0_i32_1 = arith.constant 0 : i32
    return %c0_i32, %c0_i32_0 : i32, i32
  }
  func.func @transform_4(%arg0: i32, %arg1: i32) -> (i32, i32, i32) {
    %c0_i32 = arith.constant 0 : i32
    %c0_i32_0 = arith.constant 0 : i32
    return %arg0, %c0_i32, %arg1 : i32, i32, i32
  }
}

</mosaic_0001>

<bundles_post_ra>
// kernel: tpu_custom_call.1
= control target key start
LH: loop header
LB: loop body
LE: loop exit
PB: predicated region body
PF: predicated region fallthrough
CT: control target
= control target key end

     0   :  { %s877_s0 = inlined_call_operand.hbm [shape: f32[2,4,256], index: 0, kind: input, shape index: {}]   ;;  %s878_s1 = inlined_call_operand.hbm [shape: f32[2,4,256], index: 1, kind: input, shape index: {}]   ;;  %s879_s2 = inlined_call_operand.vmem [shape: f32[8,12], index: 2, kind: input, shape index: {}]   ;;  %s880_s3 = inlined_call_operand.vmem [shape: f32[8,1], index: 3, kind: input, shape index: {}]   ;;  %s881_s4 = inlined_call_operand.hbm [shape: f32[2,8,128], index: 4, kind: output, shape index: {}]  }
   0x1   :  { %882 = sst [smem:[#allocation11_spill]] %s877_s0 }
   0x2   :  { %9 = vsyncpa [#allocation3], 0 }
   0x3   :  { %11 = vsyncpa [#allocation3 + $0x1], 0 }
   0x4   :  { %12 = vsyncpa [#allocation6], 0 }
   0x5   :  { %14 = vsyncpa [#allocation6 + $0x1], 0 }
   0x6   :  { %15 = vsyncpa [#allocation4], 0 }
   0x7   :  { %17 = vsyncpa [#allocation4 + $0x1], 0  ;;  %s734_s15 = smov 0   ;;  %s736_s16 = smov 0  }
   0x8   :  { %s738_s17 = smov 0   ;;  %s740_s18 = smov 0  }
   0x9   :  { %s742_s19 = smov 0   ;;  %s744_s20 = smov 0  }
   0xa LB: > { %s459_s21 = sadd.s32 4294967295, %s704_s20   ;;  %s460_s22 = sadd.s32 4294967294, %s704_s20   ;;  %s704_s20 = sphi %s744_s20, %s23_s20   ;;  %s700_s19 = sphi %s742_s19, %s893_s19   ;;  %s696_s18 = sphi %s740_s18, %s892_s18   ;;  %s692_s17 = sphi %s738_s17, %s891_s17   ;;  %s688_s16 = sphi %s736_s16, %s890_s16   ;;  %s684_s15 = sphi %s734_s15, %s889_s15  }
   0xb   : > { %s35_s23 = sadd.s32 1, %s700_s19  ;;  %s44_s24 = sadd.s32 1, %s692_s17 }
   0xc   : > { %p37_p0 = scmp.ge.s32.totalorder %s35_s23, 2  ;;  %p51_p1 = scmp.ne.s32.totalorder %s692_s17, %s688_s16 }
   0xd   : > { %p52_p2 = scmp.eq.s32.totalorder %s704_s20, 0  ;;  %p57_p3 = scmp.ne.s32.totalorder %s688_s16, %s684_s15 }
   0xe   : > { %s895_s23 = smov (%p37_p0, %s35_s23), 0  ;;  %p58_p5 = scmp.eq.s32.totalorder %s459_s21, 0 }
   0xf   : > { %p775_p4 = por %p52_p2, %p51_p1  ;;  %s39_s26 = ssub.s32 %s700_s19, %s895_s23 }
  0x10   : > { %p155_p6 = scmp.eq.s32.totalorder %s459_s21, 1  ;;  %p42_p7 = scmp.eq.s32.totalorder %s39_s26, 0 }
  0x11   : > { %p781_p8 = por %p58_p5, %p57_p3  ;;  %p161_p10 = scmp.eq.s32.totalorder %s460_s22, 1 }
  0x12   : > { %p785_p9 = por %p155_p6, %p51_p1  ;;  %p462_p12 = scmp.ge.s32.totalorder %s704_s20, 2 }
  0x13   : > { %s790_s29 = scalar_select %p42_p7, %s692_s17, %s44_s24  }
  0x14   : > { %p792_p11 = por %p161_p10, %p57_p3  ;;  %p498_p13 = scmp.lt.s32.totalorder %s704_s20, 2 }
  0x15   : > { %s187_s5 = sand.u32 1, %s692_s17   ;;  %s479_s7 = sshll.u32 %s700_s19, 3 }
  0x16   : > { %s463_s6 = sshll.u32 %s187_s5, 2  ;;  %s887_s0 = sld [smem:[#allocation11_spill]] }
  0x17   : > { %s191_s11 = scalar_lea.vmem [#allocation2], %s463_s6  ;;  %p805_p0 = pnand %p498_p13, %p775_p4 }
  0x18   : > { %s201_s12 = sshll.u32 %s191_s11, 4  ;;  %p469_p1 = scmp.ge.s32.totalorder %s704_s20, 1  ;;  %s202_s12 = int_to_ptr.vmem [resolvable:$true] %s201_s12 }
  0x19   : > { %p228_p2 = scmp.lt.s32.totalorder %s704_s20, 3  ;;  %s188_s21 = scalar_lea.sflag [#allocation3], %s187_s5 }
  0x1a   : > { %s392_s26 = scalar_lea.hbm %s878_s1, %s479_s7  ;;  %s212_s8 = scalar_lea.vmem [#allocation5], %s463_s6 }
  0x1b   : > { %p229_p3 = pnand %p469_p1, %p228_p2  ;;  %s223_s9 = sshll.u32 %s212_s8, 4  ;;  %s224_s9 = int_to_ptr.vmem [resolvable:$true] %s223_s9 }
  0x1c   : > { %s197_s10 = scalar_lea.hbm %s887_s0, %s479_s7  ;;  %s209_s11 = scalar_lea.sflag [#allocation6], %s187_s5 }
  0x1d   : > { %s199_s13 = sshll.u32 %s197_s10, 4  ;;  %s393_s10 = scalar_lea.hbm %s392_s26, 4  ;;  %s200_s13 = int_to_ptr.hbm [resolvable:$true] %s199_s13 }
  0x1e   : > { %490 = dma.hbm_to_vmem [thread:$0]  (!%p805_p0), %s200_s13, 64, %s202_s12, %s188_s21  }
  0x1f   : > { %s221_s25 = sshll.u32 %s393_s10, 4  ;;  %232 = sbr.rel (%p229_p3) target bundleno = 298 (0x12a), region = 36  ;;  %s222_s25 = int_to_ptr.hbm [resolvable:$true] %s221_s25 }
  0x20   : > { %493 = dma.hbm_to_vmem [thread:$0]  (!%p805_p0), %s222_s25, 64, %s224_s9, %s209_s11  }
  0x21   : > { %s819_s0 = sand.u32 (!%p229_p3), 1, %s688_s16  }
  0x22   : > { %s470_s12 = sshll.u32 (!%p229_p3), %s819_s0, 2  ;;  %s235_s13 = scalar_lea.sflag (!%p229_p3), [#allocation3], %s819_s0 }
  0x23   : > { %s238_s21 = scalar_lea.vmem (!%p229_p3), [#allocation2], %s470_s12 }
  0x24   : > { %671 = dma.done.wait (%p781_p8), %s235_s13, 64  }
  0x25   : > { %673 = vsyncadd (%p781_p8), %s235_s13, 4294967232  ;;  %s245_s5 = scalar_lea.sflag [#allocation6], %s819_s0  ;;  %s248_s6 = scalar_lea.vmem [#allocation5], %s470_s12 }
  0x26   : > { %675 = dma.done.wait (%p781_p8), %s245_s5, 64  }
  0x27   : > { %677 = vsyncadd (%p781_p8), %s245_s5, 4294967232  ;;  %v280_v0 = vld [vmem:[%s238_s21] sm:$0xf]  ;;  %v281_v1 = vld [vmem:[%s248_s6] sm:$0xf]  ;;  %s706_s7 = smov 126  }
  0x28   : > { %293 = vrot.lane.b32.xlu0 %v280_v0, %s706_s7  ;;  %v284_v2 = vrot.slane %v280_v0, 4  ;;  %v285_v3 = vrot.slane %v281_v1, 4  ;;  %s707_s14 = smov 127   ;;  %v302_v5 = vld [vmem:[%s880_s3] sm:$0xff]  ;;  %v708_v6 = vmov 0   ;;  %vm290_vm0 = vcmask 1039360  }
  0x29   : > { %556 = vset.pattern.permute.xlu1 %v708_v6  ;;  %557 = vset.pattern.permute.xlu0 %v708_v6  ;;  %vm297_vm1 = vcmask 1031168   ;;  %vm299_vm2 = vcmask 1043456   ;;  %v301_v15 = vld [vmem:[%s879_s2] sm:$0xff]  ;;  %vm308_vm3 = vcmask 97280   ;;  %s472_s8 = sshll.u32 %s819_s0, 3  ;;  %s476_s9 = sshll.u32 %s696_s18, 3 }
  0x2a   : > { %v551_v4 = vpack.i.bf16 %v285_v3, %v284_v2  ;;  %s347_s11 = scalar_lea.hbm %s881_s4, %s476_s9  ;;  %s278_s12 = scalar_lea.vmem [#allocation7], %s472_s8 }
  0x2b   : > { %s349_s13 = sshll.u32 %s278_s12, 4  ;;  %s351_s21 = sshll.u32 %s347_s11, 4  ;;  %s350_s13 = int_to_ptr.vmem [resolvable:$true] %s349_s13  ;;  %s352_s21 = int_to_ptr.hbm [resolvable:$true] %s351_s21 }
  0x2c   : > { %552 = vrot.lane.b32.xlu1 %v551_v4, %s707_s14  ;;  %s336_s5 = scalar_lea.sflag [#allocation4], %s819_s0  ;;  %s632_s6 = sshra.s32 %s352_s21, 4  ;;  %s633_s6 = int_to_ptr.hbm [resolvable:$true] %s632_s6 }
  0x2d   : > { %s638_s22 = scalar_lea.hbm %s881_s4, 16  ;;  %p639_p7 = scmp.lt.s32.totalorder %s633_s6, %s881_s4 }
  0x30   : > { %295 = vrot.lane.b32.xlu0 %v281_v1, %s706_s7  ;;  %s634_s7 = scalar_lea.hbm %s633_s6, 8 }
  0x31   : > { %p635_p4 = scmp.ne.s32.totalorder %s633_s6, %s634_s7  ;;  %p640_p8 = scmp.lt.s32.totalorder %s638_s22, %s634_s7 }
  0x33   : > { %p636_p5 = pnand %p635_p4, %p785_p9  ;;  %p641_p10 = por %p640_p8, %p639_p7 }
  0x34   : > { %305 = vperm.xlu1 %556, %v302_v5  }
  0x35   : > { %p637_p6 = pneg %p636_p5 }
  0x37   : > { %p642_p13 = pnand %p641_p10, %p637_p6 }
  0x9a   : > { %v294_v7 = vpop.permute.xlu0 %293 }
  0x9e   : > { %v553_v8 = vpop.permute.xlu1 %552 }
  0x9f   : > { %v555_v9 = vunpack.i.h.bf16 %v553_v8  ;;  %v554_v10 = vunpack.i.l.bf16 %v553_v8 }
  0xa1   : > { %v291_v11 = vsel %vm290_vm0, %v554_v10, %v555_v9 }
  0xa2   : > { %v296_v12 = vpop.permute.xlu0 %295  ;;  %v300_v14 = vsel %vm299_vm2, %v280_v0, %v291_v11 }
  0xa3   : > { %v298_v13 = vsel %vm297_vm1, %v294_v7, %v296_v12 }
  0xa4   : > { %473 = vmatpush.msk.msra.mxu0 %vm299_vm2, %v298_v13 }
  0xa6   : > { %329 = vmatpush.msra.mxu0 %v300_v14  ;;  %v306_v16 = vpop.permute.xlu1 %305 }
  0xa7   : > { %474 = vmatmul.msk.f32.vlgmr.msra.gmra.mxu0 %vm308_vm3, %v301_v15 }
 0x124   : > { %v331_v17 = vpop.f32.mrf.mxu0 }
 0x125   : > { %v332_v18 = vadd.f32 %v331_v17, %v306_v16 }
 0x127   : > { %334 = vst [vmem:[%s278_s12] sm:$0xff] %v332_v18 }
 0x128   : > { %645 = shalt.err (!%p642_p13)
}
 0x129   : > { %485 = dma.vmem_to_hbm [thread:$0]  (%p785_p9), %s350_s13, 128, %s352_s21, %s336_s5  }
 0x12a PF: > { %s363_s0 = sand.u32 1, %s684_s15   ;;  %p495_p0 = pnand %p462_p12, %p792_p11 }
 0x12b   : > { %s364_s26 = scalar_lea.sflag [#allocation4], %s363_s0 }
 0x12c   : > { %p496_p1 = pneg %p495_p0 }
 0x12e   : > { %679 = dma.done.wait (%p496_p1), %s364_s26, 128  }
 0x12f   : > { %681 = vsyncadd (%p496_p1), %s364_s26, 4294967168  ;;  %s23_s20 = sadd.s32 1, %s704_s20   ;;  %s889_s15 = smov %s688_s16 }
 0x130   : > { %p20_p2 = scmp.ge.s32.totalorder %s23_s20, 4   ;;  %s890_s16 = smov %s692_s17 }
 0x131   : > { %s891_s17 = smov %s790_s29  ;;  %s892_s18 = smov %s700_s19 }
 0x132   : > { %s893_s19 = smov %s895_s23  ;;  %22 = sbr.rel (!%p20_p2) target bundleno = 10 (0xa), region = 94 }
 0x137   :  { %370 = vsyncpa [#allocation3], 1 }
 0x138   :  { %372 = vsyncpa [#allocation3 + $0x1], 1 }
 0x139   :  { %373 = vsyncpa [#allocation6], 1 }
 0x13a   :  { %375 = vsyncpa [#allocation6 + $0x1], 1 }
 0x13b   :  { %376 = vsyncpa [#allocation4], 1 }
 0x13c   :  { %378 = vsyncpa [#allocation4 + $0x1], 1 }

</bundles_post_ra>
